<compile_context>
chip_gen: v5e
topology: v5e:2x2
jax: 0.10.0
libtpu: 0.0.40
codegen_flags: <defaults>
</compile_context>

<pallas_src>
import jax
import jax.numpy as jnp
from jax import lax
from jax.experimental import pallas as pl
from jax.experimental.pallas import tpu as pltpu

NEG_SLOPE = 0.01  # torch.nn.LeakyReLU default


def _leaky_relu(v):
    # 2 VALU ops (mul + max) instead of cmp + select + mul.
    return jnp.maximum(v, NEG_SLOPE * v)


def superr_kernel(x_ref, w1_ref, wmid_ref, bstk_ref, w5_ref, b5_ref, o_ref):
    x = x_ref[...]                                            # (TB, 36), compute dtype
    # Layer 1: contract the feature axis of both operands -> (25, TB).  Puts the batch
    # tile on lanes so every downstream VPU op and the output store are lane-dense.
    z = lax.dot_general(
        w1_ref[...], x,
        dimension_numbers=(((1,), (1,)), ((), ())),
        preferred_element_type=jnp.float32)                   # (25, TB) f32 acc
    h = _leaky_relu(z + bstk_ref[0])                          # bias/act in f32

    # Layers 2-4 (statically unrolled): W @ H on the MXU, f32 accumulation.
    for i in range(3):
        z = jnp.dot(wmid_ref[i], h.astype(wmid_ref.dtype),
                    preferred_element_type=jnp.float32)       # (25, TB) f32
        h = _leaky_relu(z + bstk_ref[i + 1])

    # Layer 5 (out_features=1): VPU multiply + sublane (XLU) reduce instead of an
    # N=1 MXU matmul.
    o = jnp.sum(h * w5_ref[...], axis=0, keepdims=True) + b5_ref[...]   # (1, TB)
    o_ref[...] = o.astype(o_ref.dtype)


def _cdiv(a, b):
    return -(-a // b)


def _round_up(x, m):
    return _cdiv(x, m) * m


def _select_tb(batch, tb_target):
    """Pick the batch-tile width (lanes): multiple of 128, big enough to amortize
    per-grid-step overhead, balanced so the tail tile isn't mostly padding, and
    guaranteeing >=2 grid steps when the batch allows (v7x has 2 TensorCores)."""
    tb_target = min(max(128, _round_up(tb_target, 128)), 32768)
    b_ceil = _round_up(batch, 128)
    tb = min(tb_target, b_ceil)
    num_tiles = _cdiv(b_ceil, tb)
    tb = _round_up(_cdiv(b_ceil, num_tiles), 128)             # balance tiles
    if _cdiv(b_ceil, tb) < 2 and b_ceil >= 256:               # >=2 steps for 2 TCs
        tb = _round_up(_cdiv(b_ceil, 2), 128)
    return tb


def superr_netv2_forward(x, params, *, tb=8192, compute_dtype=jnp.bfloat16):
    """Forward pass of SupErrNetv2.

    x:             (B, 36) array.
    params:        5 (W, b) pairs in PyTorch layout: W (out, in), b (out,).
    tb:            target batch tile width (lanes); adjusted internally.
    compute_dtype: dtype for x and the MXU inputs of layers 1-4 (bf16 default);
                   accumulation / bias / activation / layer 5 stay f32.
    """
    x = jnp.asarray(x)
    B = x.shape[0]
    assert x.shape[1] == 36, x.shape

    tb = _select_tb(B, tb)
    b_pad = _round_up(B, tb)
    num_tiles = b_pad // tb

    # x stays in natural (B, 36) layout -- no wrapper transpose.  Cast to the compute
    # dtype; zero-pad the batch up to a tile multiple only when needed.
    x_c = x.astype(compute_dtype)
    if b_pad != B:
        x_c = jnp.pad(x_c, ((0, b_pad - B), (0, 0)))

    # Pack parameters into a few slabs (fewer operands -> less pipeline bookkeeping).
    (w1, b1), (w2, b2), (w3, b3), (w4, b4), (w5, b5) = [
        (jnp.asarray(w, jnp.float32), jnp.asarray(b, jnp.float32)) for (w, b) in params]
    w1_c = w1.astype(compute_dtype)                               # (25, 36)
    w_mid = jnp.stack([w2, w3, w4]).astype(compute_dtype)         # (3, 25, 25)
    b_stk = jnp.stack([b1, b2, b3, b4])[:, :, None]               # (4, 25, 1) f32
    w5_c = w5.reshape(25, 1)                                      # (25, 1) f32 (VPU path)
    b5_c = b5.reshape(1, 1)                                       # (1, 1) f32

    in_specs = [
        pl.BlockSpec((tb, 36), lambda i: (i, 0)),                 # x: walks the batch
        pl.BlockSpec(w1_c.shape, lambda i: (0, 0)),               # weights: VMEM-resident
        pl.BlockSpec(w_mid.shape, lambda i: (0, 0, 0)),
        pl.BlockSpec(b_stk.shape, lambda i: (0, 0, 0)),
        pl.BlockSpec(w5_c.shape, lambda i: (0, 0)),
        pl.BlockSpec(b5_c.shape, lambda i: (0, 0)),
    ]
    out_specs = pl.BlockSpec((1, tb), lambda i: (0, i))
    out_shape = jax.ShapeDtypeStruct((1, b_pad), jnp.float32)

    flops = 2 * b_pad * (36 * 25 + 3 * 25 * 25 + 25)
    bytes_accessed = (x_c.size * x_c.dtype.itemsize
                      + b_pad * 4
                      + w1_c.size * w1_c.dtype.itemsize
                      + w_mid.size * w_mid.dtype.itemsize
                      + (b_stk.size + w5_c.size + b5_c.size) * 4)
    cost = pl.CostEstimate(flops=flops, transcendentals=0,
                           bytes_accessed=bytes_accessed)

    out = pl.pallas_call(
        superr_kernel,
        out_shape=out_shape,
        grid=(num_tiles,),
        in_specs=in_specs,
        out_specs=out_specs,
        compiler_params=pltpu.CompilerParams(
            dimension_semantics=("parallel",),
            vmem_limit_bytes=48 * 1024 * 1024),
        cost_estimate=cost,
    )(x_c, w1_c, w_mid, b_stk, w5_c, b5_c)

    # Back to PyTorch's (B, 1) output layout.
    return out[0, :B].reshape(B, 1)


def init_params(key):
    """PyTorch nn.Linear default init: U(-1/sqrt(fan_in), 1/sqrt(fan_in));
    weights in PyTorch (out, in) layout, biases (out,)."""
    sizes = [(36, 25), (25, 25), (25, 25), (25, 25), (25, 1)]
    params = []
    for (fan_in, fan_out) in sizes:
        key, kw, kb = jax.random.split(key, 3)
        bound = 1.0 / (fan_in ** 0.5)
        w = jax.random.uniform(kw, (fan_out, fan_in), jnp.float32,
                               minval=-bound, maxval=bound)
        b = jax.random.uniform(kb, (fan_out,), jnp.float32,
                               minval=-bound, maxval=bound)
        params.append((w, b))
    return params


def reference_forward(x, params):
    """Pure-JAX reference (PyTorch semantics) for correctness checking."""
    h = x.astype(jnp.float32)
    n = len(params)
    for i, (w, b) in enumerate(params):
        h = h @ w.T + b
        if i < n - 1:
            h = jnp.where(h > 0, h, NEG_SLOPE * h)
    return h


if __name__ == "__main__":
    params = init_params(jax.random.PRNGKey(0))
    key = jax.random.PRNGKey(0)

    # Small-batch test, f32 compute (single tile; batch padded 8 -> 128).
    key, kx = jax.random.split(key)
    x_small = jax.random.normal(kx, (8, 36), dtype=jnp.float32)
    out_small = jax.block_until_ready(
        superr_netv2_forward(x_small, params, compute_dtype=jnp.float32))
    ref_small = reference_forward(x_small, params)
    assert out_small.shape == (8, 1), out_small.shape
    assert jnp.allclose(out_small, ref_small, atol=1e-4, rtol=1e-4), (
        f"small-batch mismatch: {float(jnp.max(jnp.abs(out_small - ref_small)))}")

    # Multi-tile f32 test: B=300 with tb=128 -> 3 grid steps + tail padding.
    key, kx = jax.random.split(key)
    x_big = jax.random.normal(kx, (300, 36), dtype=jnp.float32)
    out_big = jax.block_until_ready(
        superr_netv2_forward(x_big, params, tb=128, compute_dtype=jnp.float32))
    ref_big = reference_forward(x_big, params)
    assert out_big.shape == (300, 1), out_big.shape
    assert jnp.allclose(out_big, ref_big, atol=1e-4, rtol=1e-4), (
        f"multi-tile mismatch: {float(jnp.max(jnp.abs(out_big - ref_big)))}")

    # Default (bf16) compute path with automatic tile selection (>=2 tiles for B=300).
    out_bf16 = jax.block_until_ready(superr_netv2_forward(x_big, params))
    assert out_bf16.shape == (300, 1), out_bf16.shape
    assert bool(jnp.all(jnp.isfinite(out_bf16)))
    bf16_err = float(jnp.max(jnp.abs(out_bf16 - ref_big)))
    assert bf16_err < 5e-2, f"bf16 path error too large: {bf16_err}"

    print("KERNEL_OK")
</pallas_src>

<mosaic_0001>
module attributes {stable_mosaic.version = 11 : i64} {
  func.func @superr_kernel(%arg0: i32, %arg1: memref<128x36xf32, #tpu.memory_space<vmem>>, %arg2: memref<25x36xf32, #tpu.memory_space<vmem>>, %arg3: memref<3x25x25xf32, #tpu.memory_space<vmem>>, %arg4: memref<4x25x1xf32, #tpu.memory_space<vmem>>, %arg5: memref<25x1xf32, #tpu.memory_space<vmem>>, %arg6: memref<1x1xf32, #tpu.memory_space<vmem>>, %arg7: memref<1x128xf32, #tpu.memory_space<vmem>>) attributes {dimension_semantics = [#tpu.dimension_semantics<parallel>], iteration_bounds = array<i64: 1>, scalar_prefetch = 0 : i64, scratch_operands = 0 : i64, tpu.core_type = #tpu.core_type<tc>, window_params = [{transform_indices = @transform_0, window_bounds = array<i64: 128, 36>}, {pipeline_mode = #tpu.pipeline_mode<synchronous>, transform_indices = @transform_1, window_bounds = array<i64: 25, 36>}, {pipeline_mode = #tpu.pipeline_mode<synchronous>, transform_indices = @transform_2, window_bounds = array<i64: 3, 25, 25>}, {pipeline_mode = #tpu.pipeline_mode<synchronous>, transform_indices = @transform_3, window_bounds = array<i64: 4, 25, 1>}, {pipeline_mode = #tpu.pipeline_mode<synchronous>, transform_indices = @transform_4, window_bounds = array<i64: 25, 1>}, {pipeline_mode = #tpu.pipeline_mode<synchronous>, transform_indices = @transform_5, window_bounds = array<i64: 1, 1>}, {transform_indices = @transform_6, window_bounds = array<i64: 1, 128>}]} {
    %c0 = arith.constant 0 : index
    %c0_0 = arith.constant 0 : index
    %0 = vector.load %arg1[%c0, %c0_0] : memref<128x36xf32, #tpu.memory_space<vmem>>, vector<128x36xf32>
    %c0_1 = arith.constant 0 : index
    %c0_2 = arith.constant 0 : index
    %1 = vector.load %arg2[%c0_1, %c0_2] : memref<25x36xf32, #tpu.memory_space<vmem>>, vector<25x36xf32>
    %cst = arith.constant dense<0.000000e+00> : vector<25x128xf32>
    %2 = tpu.matmul %1, %0, %cst {dimension_numbers = #tpu.dot_dimension_numbers<[1], [1], [0], [0], [0, 0, 1, 0], [], []>} : vector<25x36xf32>, vector<128x36xf32>, vector<25x128xf32> -> vector<25x128xf32>
    %c0_3 = arith.constant 0 : index
    %c0_4 = arith.constant 0 : index
    %c0_5 = arith.constant 0 : index
    %3 = vector.load %arg4[%c0_3, %c0_4, %c0_5] : memref<4x25x1xf32, #tpu.memory_space<vmem>>, vector<1x25x1xf32>
    %4 = vector.shape_cast %3 : vector<1x25x1xf32> to vector<25x1xf32>
    %5 = vector.broadcast %4 : vector<25x1xf32> to vector<25x128xf32>
    %6 = arith.addf %2, %5 : vector<25x128xf32>
    %cst_6 = arith.constant 0.00999999977 : f32
    %7 = vector.broadcast %cst_6 : f32 to vector<25x128xf32>
    %8 = arith.mulf %7, %6 : vector<25x128xf32>
    %9 = arith.maximumf %6, %8 : vector<25x128xf32>
    %c0_7 = arith.constant 0 : index
    %c0_8 = arith.constant 0 : index
    %c0_9 = arith.constant 0 : index
    %10 = vector.load %arg3[%c0_7, %c0_8, %c0_9] : memref<3x25x25xf32, #tpu.memory_space<vmem>>, vector<1x25x25xf32>
    %11 = vector.shape_cast %10 : vector<1x25x25xf32> to vector<25x25xf32>
    %cst_10 = arith.constant dense<0.000000e+00> : vector<25x128xf32>
    %12 = tpu.matmul %11, %9, %cst_10 {dimension_numbers = #tpu.dot_dimension_numbers<[1], [0], [0], [1], [0, 0, 1, 1], [], []>} : vector<25x25xf32>, vector<25x128xf32>, vector<25x128xf32> -> vector<25x128xf32>
    %c1 = arith.constant 1 : index
    %c0_11 = arith.constant 0 : index
    %c0_12 = arith.constant 0 : index
    %13 = vector.load %arg4[%c1, %c0_11, %c0_12] : memref<4x25x1xf32, #tpu.memory_space<vmem>>, vector<1x25x1xf32>
    %14 = vector.shape_cast %13 : vector<1x25x1xf32> to vector<25x1xf32>
    %15 = vector.broadcast %14 : vector<25x1xf32> to vector<25x128xf32>
    %16 = arith.addf %12, %15 : vector<25x128xf32>
    %cst_13 = arith.constant 0.00999999977 : f32
    %17 = vector.broadcast %cst_13 : f32 to vector<25x128xf32>
    %18 = arith.mulf %17, %16 : vector<25x128xf32>
    %19 = arith.maximumf %16, %18 : vector<25x128xf32>
    %c1_14 = arith.constant 1 : index
    %c0_15 = arith.constant 0 : index
    %c0_16 = arith.constant 0 : index
    %20 = vector.load %arg3[%c1_14, %c0_15, %c0_16] : memref<3x25x25xf32, #tpu.memory_space<vmem>>, vector<1x25x25xf32>
    %21 = vector.shape_cast %20 : vector<1x25x25xf32> to vector<25x25xf32>
    %cst_17 = arith.constant dense<0.000000e+00> : vector<25x128xf32>
    %22 = tpu.matmul %21, %19, %cst_17 {dimension_numbers = #tpu.dot_dimension_numbers<[1], [0], [0], [1], [0, 0, 1, 1], [], []>} : vector<25x25xf32>, vector<25x128xf32>, vector<25x128xf32> -> vector<25x128xf32>
    %c2 = arith.constant 2 : index
    %c0_18 = arith.constant 0 : index
    %c0_19 = arith.constant 0 : index
    %23 = vector.load %arg4[%c2, %c0_18, %c0_19] : memref<4x25x1xf32, #tpu.memory_space<vmem>>, vector<1x25x1xf32>
    %24 = vector.shape_cast %23 : vector<1x25x1xf32> to vector<25x1xf32>
    %25 = vector.broadcast %24 : vector<25x1xf32> to vector<25x128xf32>
    %26 = arith.addf %22, %25 : vector<25x128xf32>
    %cst_20 = arith.constant 0.00999999977 : f32
    %27 = vector.broadcast %cst_20 : f32 to vector<25x128xf32>
    %28 = arith.mulf %27, %26 : vector<25x128xf32>
    %29 = arith.maximumf %26, %28 : vector<25x128xf32>
    %c2_21 = arith.constant 2 : index
    %c0_22 = arith.constant 0 : index
    %c0_23 = arith.constant 0 : index
    %30 = vector.load %arg3[%c2_21, %c0_22, %c0_23] : memref<3x25x25xf32, #tpu.memory_space<vmem>>, vector<1x25x25xf32>
    %31 = vector.shape_cast %30 : vector<1x25x25xf32> to vector<25x25xf32>
    %cst_24 = arith.constant dense<0.000000e+00> : vector<25x128xf32>
    %32 = tpu.matmul %31, %29, %cst_24 {dimension_numbers = #tpu.dot_dimension_numbers<[1], [0], [0], [1], [0, 0, 1, 1], [], []>} : vector<25x25xf32>, vector<25x128xf32>, vector<25x128xf32> -> vector<25x128xf32>
    %c3 = arith.constant 3 : index
    %c0_25 = arith.constant 0 : index
    %c0_26 = arith.constant 0 : index
    %33 = vector.load %arg4[%c3, %c0_25, %c0_26] : memref<4x25x1xf32, #tpu.memory_space<vmem>>, vector<1x25x1xf32>
    %34 = vector.shape_cast %33 : vector<1x25x1xf32> to vector<25x1xf32>
    %35 = vector.broadcast %34 : vector<25x1xf32> to vector<25x128xf32>
    %36 = arith.addf %32, %35 : vector<25x128xf32>
    %cst_27 = arith.constant 0.00999999977 : f32
    %37 = vector.broadcast %cst_27 : f32 to vector<25x128xf32>
    %38 = arith.mulf %37, %36 : vector<25x128xf32>
    %39 = arith.maximumf %36, %38 : vector<25x128xf32>
    %c0_28 = arith.constant 0 : index
    %c0_29 = arith.constant 0 : index
    %40 = vector.load %arg5[%c0_28, %c0_29] : memref<25x1xf32, #tpu.memory_space<vmem>>, vector<25x1xf32>
    %41 = vector.broadcast %40 : vector<25x1xf32> to vector<25x128xf32>
    %42 = arith.mulf %39, %41 : vector<25x128xf32>
    %cst_30 = arith.constant dense<0.000000e+00> : vector<128xf32>
    %43 = vector.multi_reduction <add>, %42, %cst_30 [0] : vector<25x128xf32> to vector<128xf32>
    %44 = vector.shape_cast %43 : vector<128xf32> to vector<1x128xf32>
    %c0_31 = arith.constant 0 : index
    %c0_32 = arith.constant 0 : index
    %45 = vector.load %arg6[%c0_31, %c0_32] : memref<1x1xf32, #tpu.memory_space<vmem>>, vector<1x1xf32>
    %46 = vector.broadcast %45 : vector<1x1xf32> to vector<1x128xf32>
    %47 = arith.addf %44, %46 : vector<1x128xf32>
    %c0_33 = arith.constant 0 : index
    %c0_34 = arith.constant 0 : index
    %48 = vector.load %arg7[%c0_33, %c0_34] : memref<1x128xf32, #tpu.memory_space<vmem>>, vector<1x128xf32>
    tpu.vector_store %arg7[%c0_33, %c0_34], %47 {strides = array<i32>} : memref<1x128xf32, #tpu.memory_space<vmem>>, vector<1x128xf32>,
    return
  }
  func.func @transform_0(%arg0: i32) -> (i32, i32) {
    %c0_i32 = arith.constant 0 : i32
    %c0_i32_0 = arith.constant 0 : i32
    return %arg0, %c0_i32 : i32, i32
  }
  func.func @transform_1(%arg0: i32) -> (i32, i32) {
    %c0_i32 = arith.constant 0 : i32
    %c0_i32_0 = arith.constant 0 : i32
    %c0_i32_1 = arith.constant 0 : i32
    return %c0_i32, %c0_i32_0 : i32, i32
  }
  func.func @transform_2(%arg0: i32) -> (i32, i32, i32) {
    %c0_i32 = arith.constant 0 : i32
    %c0_i32_0 = arith.constant 0 : i32
    %c0_i32_1 = arith.constant 0 : i32
    %c0_i32_2 = arith.constant 0 : i32
    return %c0_i32, %c0_i32_0, %c0_i32_1 : i32, i32, i32
  }
  func.func @transform_3(%arg0: i32) -> (i32, i32, i32) {
    %c0_i32 = arith.constant 0 : i32
    %c0_i32_0 = arith.constant 0 : i32
    %c0_i32_1 = arith.constant 0 : i32
    %c0_i32_2 = arith.constant 0 : i32
    return %c0_i32, %c0_i32_0, %c0_i32_1 : i32, i32, i32
  }
  func.func @transform_4(%arg0: i32) -> (i32, i32) {
    %c0_i32 = arith.constant 0 : i32
    %c0_i32_0 = arith.constant 0 : i32
    %c0_i32_1 = arith.constant 0 : i32
    return %c0_i32, %c0_i32_0 : i32, i32
  }
  func.func @transform_5(%arg0: i32) -> (i32, i32) {
    %c0_i32 = arith.constant 0 : i32
    %c0_i32_0 = arith.constant 0 : i32
    %c0_i32_1 = arith.constant 0 : i32
    return %c0_i32, %c0_i32_0 : i32, i32
  }
  func.func @transform_6(%arg0: i32) -> (i32, i32) {
    %c0_i32 = arith.constant 0 : i32
    %c0_i32_0 = arith.constant 0 : i32
    return %c0_i32, %arg0 : i32, i32
  }
}

</mosaic_0001>

<bundles_post_ra>
// kernel: tpu_custom_call.1
= control target key start
LH: loop header
LB: loop body
LE: loop exit
PB: predicated region body
PF: predicated region fallthrough
CT: control target
= control target key end

     0   :  { %s799_s0 = inlined_call_operand.vmem [shape: f32[128,36], index: 0, kind: input, shape index: {}]   ;;  %s800_s1 = inlined_call_operand.vmem [shape: f32[25,36], index: 1, kind: input, shape index: {}]   ;;  %s801_s2 = inlined_call_operand.vmem [shape: f32[3,25,25], index: 2, kind: input, shape index: {}]   ;;  %s802_s3 = inlined_call_operand.vmem [shape: f32[4,25,1], index: 3, kind: input, shape index: {}]   ;;  %s803_s4 = inlined_call_operand.vmem [shape: f32[25,1], index: 4, kind: input, shape index: {}]   ;;  %s804_s5 = inlined_call_operand.<no memory space> [shape: f32[1,1], index: 5, kind: input, shape index: {}]   ;;  %s805_s6 = inlined_call_operand.hbm [shape: f32[1,128], index: 6, kind: output, shape index: {}]  }
   0x1   :  { %v11_v0 = vstv %s804_s5 }
   0x2   :  { %12 = vst [vmem:[#allocation2] sm:$0x1] %v11_v0 }
   0x3   :  { %v41_v1 = vld [vmem:[%s799_s0 + $0x78] sm:$0xff]  ;;  %vm70_vm0 = vcmask 293888   ;;  %v40_v2 = vld [vmem:[%s799_s0 + $0x70] sm:$0xff] }
   0x4   :  { %478 = vmatpush.xpose.msk.msra.mxu0 %vm70_vm0, %v41_v1 }
   0x5   :  { %13 = vsyncpa [#allocation4], 0  ;;  %v39_v3 = vld [vmem:[%s799_s0 + $0x68] sm:$0xff]  ;;  %v49_v4 = vld [vmem:[%s802_s3 + $0x18] sm:$0x1]  ;;  %v564_v6 = vmov 0  }
   0x6   :  { %v38_v5 = vld [vmem:[%s799_s0 + $0x60] sm:$0xff]  ;;  %535 = vset.pattern.permute.xlu0 %v564_v6  ;;  %536 = vset.pattern.permute.xlu1 %v564_v6  ;;  %v47_v7 = vld [vmem:[%s802_s3 + $0x8] sm:$0xff]  ;;  %v37_v8 = vld [vmem:[%s799_s0 + $0x58] sm:$0xff]  ;;  %vm210_vm1 = vcmask 1040384   ;;  %vm197_vm2 = vcmask 203776   ;;  %s469_s24 = sshll.u32 %s805_s6, 4  ;;  %s470_s24 = int_to_ptr.hbm [resolvable:$true] %s469_s24 }
   0x7   :  { %67 = vperm.xlu0 %535, %v49_v4   ;;  %537 = vset.pattern.permute.xlu2 %v564_v6  ;;  %v48_v9 = vld [vmem:[%s802_s3 + $0x10] sm:$0xff]  ;;  %v46_v11 = vld [vmem:[%s802_s3] sm:$0xff]  ;;  %v35_v12 = vld [vmem:[%s799_s0 + $0x48] sm:$0xff] }
   0x8   :  { %479 = vmatpush.xpose.msk.msra.mxu0 %vm70_vm0, %v40_v2  ;;  %57 = vperm.xlu1 %536, %v47_v7   ;;  %v36_v10 = vld [vmem:[%s799_s0 + $0x50] sm:$0xff]  ;;  %v499_v13 = vld [vmem:[%s802_s3 + $0x28] sm:$0xff]  ;;  %v34_v14 = vld [vmem:[%s799_s0 + $0x40] sm:$0xff] }
   0x9   :  { %v33_v15 = vld [vmem:[%s799_s0 + $0x38] sm:$0xff]  ;;  %v498_v16 = vld [vmem:[%s802_s3 + $0x20] sm:$0xff]  ;;  %v513_v17 = vld [vmem:[%s802_s3 + $0x50] sm:$0xff] }
   0xa   :  { %v32_v18 = vld [vmem:[%s799_s0 + $0x30] sm:$0xff]  ;;  %v31_v19 = vld [vmem:[%s799_s0 + $0x28] sm:$0xff]  ;;  %v524_v21 = vld [vmem:[%s802_s3 + $0x60] sm:$0xff] }
   0xb   :  { %v512_v20 = vld [vmem:[%s802_s3 + $0x48] sm:$0xff]  ;;  %v30_v22 = vld [vmem:[%s799_s0 + $0x20] sm:$0xff]  ;;  %v29_v23 = vld [vmem:[%s799_s0 + $0x18] sm:$0xff] }
   0xc   :  { %480 = vmatpush.xpose.msk.msra.mxu0 %vm70_vm0, %v39_v3  ;;  %v525_v24 = vld [vmem:[%s802_s3 + $0x68] sm:$0xff]  ;;  %v527_v25 = vld [vmem:[%s802_s3 + $0x78] sm:$0x1]  ;;  %v28_v26 = vld [vmem:[%s799_s0 + $0x10] sm:$0xff] }
   0xd   :  { %v27_v27 = vld [vmem:[%s799_s0 + $0x8] sm:$0xff]  ;;  %v415_v28 = vld [vmem:[%s803_s4] sm:$0xff]  ;;  %v417_v29 = vld [vmem:[%s803_s4 + $0x10] sm:$0xff] }
   0xe   :  { %v26_v30 = vld [vmem:[%s799_s0] sm:$0xff]  ;;  %v418_v32 = vld [vmem:[%s803_s4 + $0x18] sm:$0x1]  ;;  %v43_v33 = vld [vmem:[%s800_s1 + $0x8] sm:$0xff] }
   0xf   :  { %62 = vperm.xlu0 %535, %v48_v9   ;;  %v42_v31 = vld [vmem:[%s800_s1] sm:$0xff]  ;;  %v44_v34 = vld [vmem:[%s800_s1 + $0x10] sm:$0xff]  ;;  %v45_v35 = vld [vmem:[%s800_s1 + $0x18] sm:$0x1] }
  0x10   :  { %481 = vmatpush.xpose.msk.msra.mxu0 %vm70_vm0, %v38_v5  ;;  %52 = vperm.xlu1 %536, %v46_v11   ;;  %v501_v37 = vld [vmem:[%s802_s3 + $0x38] sm:$0x1]  ;;  %v500_v40 = vld [vmem:[%s802_s3 + $0x30] sm:$0xff]  ;;  %v511_v55 = vld [vmem:[%s802_s3 + $0x40] sm:$0xff] }
  0x11   :  { %194 = vperm.xlu2 %537, %v501_v37   ;;  %v514_v44 = vld [vmem:[%s802_s3 + $0x58] sm:$0x1]  ;;  %v168_v60 = vld [vmem:[%s801_s2] sm:$0xff]  ;;  %v526_v61 = vld [vmem:[%s802_s3 + $0x70] sm:$0xff] }
  0x12   :  { %v169_v62 = vld [vmem:[%s801_s2 + $0x8] sm:$0xff]  ;;  %v170_v0 = vld [vmem:[%s801_s2 + $0x10] sm:$0xff]  ;;  %v453_v1 = vld [vmem:[#allocation2] sm:$0x1] }
  0x13   :  { %v416_v63 = vld [vmem:[%s803_s4 + $0x8] sm:$0xff]  ;;  %v171_v2 = vld [vmem:[%s801_s2 + $0x18] sm:$0x1] }
  0x14   :  { %482 = vmatpush.xpose.msk.msra.mxu0 %vm70_vm0, %v37_v8 }
  0x17   :  { %184 = vperm.xlu0 %535, %v499_v13  }
  0x18   :  { %483 = vmatpush.xpose.msk.msra.mxu0 %vm70_vm0, %v36_v10  ;;  %179 = vperm.xlu1 %536, %v498_v16  }
  0x19   :  { %189 = vperm.xlu2 %537, %v500_v40  }
  0x1c   :  { %484 = vmatpush.xpose.msk.msra.mxu0 %vm70_vm0, %v35_v12 }
  0x1f   :  { %273 = vperm.xlu0 %535, %v513_v17  }
  0x20   :  { %485 = vmatpush.xpose.msk.msra.mxu0 %vm70_vm0, %v34_v14  ;;  %268 = vperm.xlu1 %536, %v512_v20  }
  0x21   :  { %278 = vperm.xlu2 %537, %v514_v44  }
  0x24   :  { %486 = vmatpush.xpose.msk.msra.mxu0 %vm70_vm0, %v33_v15 }
  0x27   :  { %345 = vperm.xlu0 %535, %v524_v21  }
  0x28   :  { %487 = vmatpush.xpose.msk.msra.mxu0 %vm70_vm0, %v32_v18  ;;  %350 = vperm.xlu1 %536, %v525_v24   ;;  %v508_v24 = vld [vmem:[%s801_s2 + $0x28] sm:$0xff] }
  0x29   :  { %263 = vperm.xlu2 %537, %v511_v55  }
  0x2c   :  { %488 = vmatpush.xpose.msk.msra.mxu0 %vm70_vm0, %v31_v19 }
  0x2f   :  { %360 = vperm.xlu0 %535, %v527_v25   ;;  %v509_v25 = vld [vmem:[%s801_s2 + $0x30] sm:$0xff] }
  0x30   :  { %489 = vmatpush.xpose.msk.msra.mxu0 %vm70_vm0, %v30_v22  ;;  %421 = vperm.xlu1 %536, %v415_v28  }
  0x31   :  { %355 = vperm.xlu2 %537, %v526_v61  }
  0x34   :  { %490 = vmatpush.xpose.msk.msra.mxu0 %vm70_vm0, %v29_v23  ;;  %v507_v23 = vld [vmem:[%s801_s2 + $0x20] sm:$0xff] }
  0x37   :  { %431 = vperm.xlu0 %535, %v417_v29  }
  0x38   :  { %491 = vmatpush.xpose.msk.msra.mxu0 %vm70_vm0, %v28_v26  ;;  %436 = vperm.xlu1 %536, %v418_v32   ;;  %v510_v26 = vld [vmem:[%s801_s2 + $0x38] sm:$0x1] }
  0x39   :  { %426 = vperm.xlu2 %537, %v416_v63  }
  0x3c   :  { %492 = vmatpush.xpose.msk.msra.mxu0 %vm70_vm0, %v27_v27 }
  0x40   :  { %493 = vmatpush.xpose.msk.msra.mxu0 %vm70_vm0, %v26_v30 }
  0x41   :  { %456 = vperm.xlu2 %537, %v453_v1  }
  0x43   :  { %494 = vmatmul.msk.f32.vlgmr.msra.gmra.mxu0 %vm70_vm0, %v42_v31 }
  0x4b   :  { %495 = vmatmul.msk.f32.gmra.mxu0 %vm70_vm0, %v43_v33 }
  0x53   :  { %496 = vmatmul.msk.f32.gmra.mxu0 %vm70_vm0, %v44_v34 }
  0x5b   :  { %497 = vmatmul.msk.f32.gmra.mxu0 %vm70_vm0, %v45_v35 }
  0x6b   :  { %v195_v5 = vpop.permute.xlu2 %194 }
  0x73   :  { %v190_v7 = vpop.permute.xlu2 %189 }
  0x79   :  { %v68_v39 = vpop.permute.xlu0 %67 }
  0x7a   :  { %v58_v41 = vpop.permute.xlu1 %57 }
  0x7b   :  { %v279_v29 = vpop.permute.xlu2 %278 }
  0x81   :  { %v63_v43 = vpop.permute.xlu0 %62 }
  0x82   :  { %v53_v49 = vpop.permute.xlu1 %52 }
  0x83   :  { %v264_v37 = vpop.permute.xlu2 %263 }
  0x89   :  { %v185_v9 = vpop.permute.xlu0 %184 }
  0x8a   :  { %v180_v13 = vpop.permute.xlu1 %179 }
  0x91   :  { %v274_v31 = vpop.permute.xlu0 %273 }
  0x92   :  { %v269_v33 = vpop.permute.xlu1 %268 }
  0xc0   :  { %v148_v36 = vpop.f32.mrf.mxu0 }
  0xc1   :  { %v149_v50 = vadd.f32 %v148_v36, %v53_v49  ;;  %v522_v49 = vld [vmem:[%s801_s2 + $0x50] sm:$0xff] }
  0xc3   :  { %v160_v56 = vmul.f32 0.01, %v149_v50 }
  0xc5   :  { %v164_v59 = vmax.f32 %v149_v50, %v160_v56  ;;  %v523_v50 = vld [vmem:[%s801_s2 + $0x58] sm:$0x1]  ;;  %v356_v56 = vpop.permute.xlu2 %355 }
  0xc8   :  { %v151_v38 = vpop.f32.mrf.mxu0 }
  0xc9   :  { %v152_v47 = vadd.f32 %v151_v38, %v58_v41 }
  0xcb   :  { %v161_v53 = vmul.f32 0.01, %v152_v47 }
  0xcd   :  { %v165_v58 = vmax.f32 %v152_v47, %v161_v53  ;;  %v520_v47 = vld [vmem:[%s801_s2 + $0x40] sm:$0xff] }
  0xd0   :  { %v154_v42 = vpop.f32.mrf.mxu0 }
  0xd1   :  { %v155_v45 = vadd.f32 %v154_v42, %v63_v43 }
  0xd3   :  { %v162_v51 = vmul.f32 0.01, %v155_v45 }
  0xd5   :  { %v166_v57 = vmax.f32 %v155_v45, %v162_v51 }
  0xd8   :  { %v157_v46 = vpop.f32.mrf.mxu0 }
  0xd9   :  { %v158_v48 = vadd.f32 %v157_v46, %v68_v39 }
  0xdb   :  { %v163_v52 = vmul.f32 0.01, %v158_v48 }
  0xdd   :  { %v167_v54 = vmax.f32 %v158_v48, %v163_v52  ;;  %v521_v48 = vld [vmem:[%s801_s2 + $0x48] sm:$0xff]  ;;  %v346_v52 = vpop.permute.xlu0 %345  ;;  %s565_s2 = smov [#allocation3]  }
  0xde   :  { %s467_s21 = sshll.u32 %s565_s2, 4  ;;  %s468_s21 = int_to_ptr.vmem [resolvable:$true] %s467_s21 }
  0xdf   :  { %502 = vmatpush.msk.msra.mxu1 %vm210_vm1, %v167_v54  ;;  %v351_v54 = vpop.permute.xlu1 %350 }
  0xe1   :  { %227 = vmatpush.msra.mxu1 %v166_v57 }
  0xe3   :  { %228 = vmatpush.msra.mxu1 %v165_v58 }
  0xe5   :  { %229 = vmatpush.msra.mxu1 %v164_v59  ;;  %v361_v59 = vpop.permute.xlu0 %360 }
  0xe6   :  { %503 = vmatmul.msk.f32.vlgmr.msra.gmra.mxu1 %vm197_vm2, %v168_v60 }
  0xee   :  { %504 = vmatmul.msk.f32.gmra.mxu1 %vm197_vm2, %v169_v62  ;;  %v422_v62 = vpop.permute.xlu1 %421 }
  0xf6   :  { %505 = vmatmul.msk.f32.gmra.mxu1 %vm197_vm2, %v170_v0 }
  0xfe   :  { %506 = vmatmul.msk.f32.gmra.mxu1 %vm197_vm2, %v171_v2 }
 0x163   :  { %v231_v3 = vpop.f32.mrf.mxu1 }
 0x164   :  { %v232_v14 = vadd.f32 %v231_v3, %v180_v13  ;;  %v437_v13 = vpop.permute.xlu1 %436 }
 0x166   :  { %v243_v19 = vmul.f32 0.01, %v232_v14 }
 0x168   :  { %v247_v22 = vmax.f32 %v232_v14, %v243_v19 }
 0x16b   :  { %v234_v4 = vpop.f32.mrf.mxu1 }
 0x16c   :  { %v235_v11 = vadd.f32 %v234_v4, %v185_v9 }
 0x16e   :  { %v244_v17 = vmul.f32 0.01, %v235_v11 }
 0x170   :  { %v248_v21 = vmax.f32 %v235_v11, %v244_v17 }
 0x173   :  { %v237_v6 = vpop.f32.mrf.mxu1 }
 0x174   :  { %v238_v8 = vadd.f32 %v237_v6, %v190_v7 }
 0x176   :  { %v245_v15 = vmul.f32 0.01, %v238_v8 }
 0x178   :  { %v249_v20 = vmax.f32 %v238_v8, %v245_v15  ;;  %v432_v8 = vpop.permute.xlu0 %431 }
 0x17b   :  { %v240_v10 = vpop.f32.mrf.mxu1 }
 0x17c   :  { %v241_v12 = vadd.f32 %v240_v10, %v195_v5  ;;  %v427_v5 = vpop.permute.xlu2 %426 }
 0x17e   :  { %v246_v16 = vmul.f32 0.01, %v241_v12 }
 0x180   :  { %v250_v18 = vmax.f32 %v241_v12, %v246_v16 }
 0x182   :  { %515 = vmatpush.msk.msra.mxu2 %vm210_vm1, %v250_v18 }
 0x184   :  { %309 = vmatpush.msra.mxu2 %v249_v20 }
 0x186   :  { %310 = vmatpush.msra.mxu2 %v248_v21 }
 0x188   :  { %311 = vmatpush.msra.mxu2 %v247_v22 }
 0x189   :  { %516 = vmatmul.msk.f32.vlgmr.msra.gmra.mxu2 %vm197_vm2, %v507_v23  ;;  %v457_v23 = vpop.permute.xlu2 %456 }
 0x191   :  { %517 = vmatmul.msk.f32.gmra.mxu2 %vm197_vm2, %v508_v24 }
 0x199   :  { %518 = vmatmul.msk.f32.gmra.mxu2 %vm197_vm2, %v509_v25  ;;  %v459_v25 = vperm.slane %v457_v23, 0 }
 0x1a1   :  { %519 = vmatmul.msk.f32.gmra.mxu2 %vm197_vm2, %v510_v26 }
 0x20c   :  { %v313_v27 = vpop.f32.mrf.mxu2 }
 0x20d   :  { %v314_v38 = vadd.f32 %v313_v27, %v264_v37 }
 0x20f   :  { %v325_v43 = vmul.f32 0.01, %v314_v38 }
 0x211   :  { %v329_v46 = vmax.f32 %v314_v38, %v325_v43 }
 0x214   :  { %v316_v28 = vpop.f32.mrf.mxu2 }
 0x215   :  { %v317_v35 = vadd.f32 %v316_v28, %v269_v33 }
 0x217   :  { %v326_v41 = vmul.f32 0.01, %v317_v35 }
 0x219   :  { %v330_v45 = vmax.f32 %v317_v35, %v326_v41 }
 0x21c   :  { %v319_v30 = vpop.f32.mrf.mxu2 }
 0x21d   :  { %v320_v32 = vadd.f32 %v319_v30, %v274_v31 }
 0x21f   :  { %v327_v39 = vmul.f32 0.01, %v320_v32 }
 0x221   :  { %v331_v44 = vmax.f32 %v320_v32, %v327_v39 }
 0x224   :  { %v322_v34 = vpop.f32.mrf.mxu2 }
 0x225   :  { %v323_v36 = vadd.f32 %v322_v34, %v279_v29 }
 0x227   :  { %v328_v40 = vmul.f32 0.01, %v323_v36 }
 0x229   :  { %v332_v42 = vmax.f32 %v323_v36, %v328_v40 }
 0x22b   :  { %528 = vmatpush.msk.msra.mxu3 %vm210_vm1, %v332_v42 }
 0x22d   :  { %391 = vmatpush.msra.mxu3 %v331_v44 }
 0x22f   :  { %392 = vmatpush.msra.mxu3 %v330_v45 }
 0x231   :  { %393 = vmatpush.msra.mxu3 %v329_v46 }
 0x232   :  { %529 = vmatmul.msk.f32.vlgmr.msra.gmra.mxu3 %vm197_vm2, %v520_v47 }
 0x23a   :  { %530 = vmatmul.msk.f32.gmra.mxu3 %vm197_vm2, %v521_v48 }
 0x242   :  { %531 = vmatmul.msk.f32.gmra.mxu3 %vm197_vm2, %v522_v49 }
 0x24a   :  { %532 = vmatmul.msk.f32.gmra.mxu3 %vm197_vm2, %v523_v50 }
 0x2b5   :  { %v395_v51 = vpop.f32.mrf.mxu3 }
 0x2b6   :  { %v396_v57 = vadd.f32 %v395_v51, %v346_v52 }
 0x2b8   :  { %v407_v63 = vmul.f32 0.01, %v396_v57 }
 0x2ba   :  { %v411_v2 = vmax.f32 %v396_v57, %v407_v63 }
 0x2bc   :  { %v439_v10 = vmul.f32 %v422_v62, %v411_v2 }
 0x2bd   :  { %v398_v53 = vpop.f32.mrf.mxu3 }
 0x2be   :  { %v399_v55 = vadd.f32 %v398_v53, %v351_v54 }
 0x2c0   :  { %v408_v61 = vmul.f32 0.01, %v399_v55 }
 0x2c2   :  { %v412_v1 = vmax.f32 %v399_v55, %v408_v61 }
 0x2c4   :  { %v440_v7 = vmul.f32 %v427_v5, %v412_v1 }
 0x2c5   :  { %v401_v58 = vpop.f32.mrf.mxu3 }
 0x2c6   :  { %v402_v60 = vadd.f32 %v401_v58, %v356_v56  ;;  %v443_v14 = vadd.f32 %v440_v7, %v439_v10 }
 0x2c8   :  { %v409_v0 = vmul.f32 0.01, %v402_v60 }
 0x2ca   :  { %v413_v3 = vmax.f32 %v402_v60, %v409_v0 }
 0x2cc   :  { %v441_v11 = vmul.f32 %v432_v8, %v413_v3 }
 0x2cd   :  { %v404_v4 = vpop.f32.mrf.mxu3 }
 0x2ce   :  { %v405_v6 = vadd.f32 %v404_v4, %v361_v59  ;;  %v444_v16 = vadd.f32 %v443_v14, %v441_v11 }
 0x2d0   :  { %v410_v9 = vmul.f32 0.01, %v405_v6 }
 0x2d2   :  { %v414_v12 = vmax.f32 %v405_v6, %v410_v9 }
 0x2d4   :  { %v442_v15 = vmul.f32 %v437_v13, %v414_v12 }
 0x2d6   :  { %v445_v17 = vsel %vm210_vm1, %v442_v15, 0.0 }
 0x2d7   :  { %v446_v18 = vadd.f32 %v445_v17, %v444_v16 }
 0x2d9   :  { %v447_v19 = vrot.slane %v446_v18, 4 }
 0x2db   :  { %v448_v20 = vadd.f32 %v447_v19, %v446_v18 }
 0x2dd   :  { %v449_v21 = vrot.slane %v448_v20, 2 }
 0x2df   :  { %v450_v22 = vadd.f32 %v449_v21, %v448_v20 }
 0x2e1   :  { %v451_v24 = vrot.slane %v450_v22, 1 }
 0x2e3   :  { %v452_v26 = vadd.f32 %v451_v24, %v450_v22 }
 0x2e5   :  { %v460_v27 = vadd.f32 %v459_v25, %v452_v26 }
 0x2e7   :  { %461 = vst [vmem:[#allocation3] sm:$0x1] %v460_v27 }
 0x2e8   :  { %472 = dma.vmem_to_hbm [thread:$0]  %s468_s21, 16, %s470_s24, [#allocation4]  }
 0x2e9   :  { %562 = dma.done.wait [#allocation4], 16  }
 0x2ea   :  { %563 = vsyncadd [#allocation4], 4294967280 }
 0x2eb   :  { %477 = vsyncpa [#allocation4], 1 }

</bundles_post_ra>
